<compile_context>
chip_gen: v6e
topology: v6e:2x2x1
jax: 0.10.0
libtpu: 0.0.40
codegen_flags: <defaults>
</compile_context>

<pallas_src>
from functools import partial

import jax
import jax.numpy as jnp
from jax.experimental import pallas as pl
from jax.experimental.pallas import tpu as pltpu

_LANE = 128   # lane width: feature (out / inner hidden) dims padded to this
_SUBLANE = 8  # minimum sublane multiple for the batch tile (f32)


def _round_up(n, m):
    return ((n + m - 1) // m) * m


def _pad_to(a, shape):
    """Zero-pad `a` up to `shape`.  Zero fill is load-bearing: padded weight /
    bias lanes must stay exactly 0 so they contribute nothing through
    matmul -> bias -> ReLU, letting the final slice recover the true output."""
    pads = [(0, s - d) for d, s in zip(a.shape, shape)]
    return jnp.pad(a, pads)  # default constant fill = 0


def _resident_spec(shape):
    """Constant-index BlockSpec: block stays resident in VMEM across grid
    steps (no re-DMA).  Single-buffered (pl.Buffered(1)) when supported so it
    does not pay for a second pipeline buffer it never uses."""
    index_map = lambda i: (0, 0)
    buffered = getattr(pl, "Buffered", None)
    if buffered is not None:
        try:
            return pl.BlockSpec(shape, index_map, pipeline_mode=buffered(1))
        except TypeError:  # older BlockSpec without pipeline_mode kwarg
            pass
    return pl.BlockSpec(shape, index_map)


def _make_mlp_kernel(n_linear):
    """Kernel for an MLP with `n_linear` Linear layers.

    Signature: kernel(x_ref, w0, b0, ..., w_{n-1}, b_{n-1}, out_ref).
    ReLU after every layer except the last (matches FlowMLP.forward).
    Matmuls run in the weight dtype (bf16) on the MXU with f32 accumulation;
    bias add / ReLU stay in f32 on the VPU.
    """

    def kernel(x_ref, *refs):
        out_ref = refs[-1]
        param_refs = refs[:-1]
        h = x_ref[...].astype(jnp.float32)
        for i in range(n_linear):
            w = param_refs[2 * i][...]                              # bf16
            b = param_refs[2 * i + 1][...].astype(jnp.float32)      # f32
            acc = jnp.dot(h.astype(w.dtype), w,
                          preferred_element_type=jnp.float32) + b   # MXU + VPU
            h = jnp.maximum(acc, 0.0) if i < n_linear - 1 else acc  # ReLU (f32)
        out_ref[...] = h.astype(out_ref.dtype)

    return kernel


def prepare_flow_mlp_params(params, param_dtype=jnp.bfloat16):
    """One-time (init-time) parameter preparation — hoisted out of the hot path.

    * Pads every layer's out-feature dim (and the K dim of every layer except
      the first) to 128-lane multiples with ZEROS (see _pad_to).
    * Casts weights to `param_dtype` (bf16 by default) for the MXU fast path;
      biases stay f32 because the bias add happens in f32.
    Returns a tuple of (w, b): w (K_true_or_pad, N_pad), b (1, N_pad).
    """
    prepared = []
    prev_out_pad = None
    for layer_idx, (w, b) in enumerate(params):
        fin, fout = w.shape
        fout_pad = _round_up(fout, _LANE)
        # First layer keeps its true K (= dim + 1) so x is read at its real
        # width; later layers pad K to match the previous padded out-features.
        fin_pad = fin if layer_idx == 0 else prev_out_pad
        assert fin_pad >= fin
        w_p = _pad_to(w, (fin_pad, fout_pad)).astype(param_dtype)
        b_p = _pad_to(b.reshape(1, -1), (1, fout_pad)).astype(jnp.float32)
        prepared.append((w_p, b_p))
        prev_out_pad = fout_pad
    return tuple(prepared)


@partial(jax.jit, static_argnames=("out_dim", "block_batch"))
def flow_mlp_forward(x, padded_params, out_dim=None, block_batch=1024):
    """Fused FlowMLP forward.

    x             : (batch, dim + 1)
    padded_params : output of prepare_flow_mlp_params (done once at init)
    out_dim       : true output feature count (defaults to dim = x.shape[1]-1)
    returns       : (batch, out_dim)
    """
    n_linear = len(padded_params)
    batch, in_features = x.shape
    if out_dim is None:
        out_dim = in_features - 1            # FlowMLP maps (dim + 1) -> dim
    out_pad = padded_params[-1][0].shape[1]

    # --- batch tile: dtype-appropriate sublane multiple; keep >= 2 grid steps
    #     where batch permits (v7x shards the "parallel" axis over 2 TCs).
    itemsize = jnp.dtype(x.dtype).itemsize
    sub = max(_SUBLANE, 32 // itemsize)
    tb = min(block_batch, _round_up(batch, sub))
    if batch >= 2 * sub:
        tb = min(tb, _round_up(-(-batch // 2), sub))
    tb = _round_up(tb, sub)
    batch_pad = _round_up(batch, tb)

    # Batch-only zero pad (features are NOT padded); fuses under jit.
    x_p = x if batch_pad == batch else jnp.pad(x, ((0, batch_pad - batch), (0, 0)))

    # --- VMEM budget: resident params + double-buffered I/O tiles + live acts
    param_bytes = sum(w.size * w.dtype.itemsize + b.size * b.dtype.itemsize
                      for (w, b) in padded_params)
    max_feat = max([in_features] + [w.shape[1] for (w, _) in padded_params])
    io_bytes = 2 * (tb * in_features + tb * out_pad) * itemsize
    act_bytes = 4 * tb * max_feat * 4          # generous: live f32 activations
    needed = param_bytes + io_bytes + act_bytes
    vmem_limit = int(min(max(2 * needed, 32 * 1024 * 1024), 100 * 1024 * 1024))

    operands = [x_p]
    in_specs = [pl.BlockSpec((tb, in_features), lambda i: (i, 0))]
    for (w_p, b_p) in padded_params:
        operands.append(w_p)
        in_specs.append(_resident_spec(w_p.shape))
        operands.append(b_p)
        in_specs.append(_resident_spec(b_p.shape))

    out_full = pl.pallas_call(
        _make_mlp_kernel(n_linear),
        grid=(batch_pad // tb,),
        out_shape=jax.ShapeDtypeStruct((batch_pad, out_pad), x.dtype),
        in_specs=in_specs,
        # Lane-dense (128-multiple) output store; padded lanes sliced off below.
        out_specs=pl.BlockSpec((tb, out_pad), lambda i: (i, 0)),
        compiler_params=pltpu.CompilerParams(
            dimension_semantics=("parallel",),
            vmem_limit_bytes=vmem_limit,
        ),
    )(*operands)

    # Slice off batch padding and lane padding of the final layer (fuses under jit).
    return out_full[:batch, :out_dim]


def init_flow_mlp_params(key, dim, hidden_dim, num_layers, dtype=jnp.float32):
    """Init mirroring torch.nn.Linear default (uniform +/- 1/sqrt(fan_in)).

    Layer sizes: (dim+1 -> hidden), (hidden -> hidden) x (num_layers-1),
                 (hidden -> dim).
    """
    sizes = [(dim + 1, hidden_dim)]
    sizes += [(hidden_dim, hidden_dim) for _ in range(num_layers - 1)]
    sizes += [(hidden_dim, dim)]

    params = []
    for (fan_in, fan_out) in sizes:
        key, kw, kb = jax.random.split(key, 3)
        bound = 1.0 / (fan_in ** 0.5)
        w = jax.random.uniform(kw, (fan_in, fan_out), dtype=dtype,
                               minval=-bound, maxval=bound)
        b = jax.random.uniform(kb, (1, fan_out), dtype=dtype,
                               minval=-bound, maxval=bound)
        params.append((w, b))
    return params


def _reference_forward_f32(x, params):
    """Pure-f32 reference (matches the torch module exactly)."""
    h = x
    for i, (w, b) in enumerate(params):
        h = h @ w + b
        if i < len(params) - 1:
            h = jnp.maximum(h, 0.0)
    return h


def _reference_forward_matched(x, padded_params, out_dim):
    """Reference that mirrors the kernel's bf16-operand / f32-accum math."""
    h = x.astype(jnp.float32)
    n = len(padded_params)
    for i, (w, b) in enumerate(padded_params):
        acc = jnp.dot(h.astype(w.dtype), w,
                      preferred_element_type=jnp.float32) + b.astype(jnp.float32)
        h = jnp.maximum(acc, 0.0) if i < n - 1 else acc
    return h[:, :out_dim]


if __name__ == "__main__":
    key = jax.random.PRNGKey(0)

    dim = 4
    hidden_dim = 32
    num_layers = 2   # -> 3 Linear layers total: (5->32), (32->32), (32->4)
    batch = 512      # default tiling gives 2 grid steps of 256 (parallel axis)

    key, k_x, k_p = jax.random.split(key, 3)
    # FlowMLP takes x of shape (batch, dim + 1)  (state concatenated with time).
    x = jax.random.normal(k_x, (batch, dim + 1), dtype=jnp.float32)
    raw_params = init_flow_mlp_params(k_p, dim, hidden_dim, num_layers)

    # One-time param prep (pad + bf16 cast), then the jitted fused forward.
    padded_params = prepare_flow_mlp_params(raw_params)
    out = jax.block_until_ready(flow_mlp_forward(x, padded_params, out_dim=dim))

    assert out.shape == (batch, dim)
    assert out.dtype == x.dtype

    # Tight check vs. a reference that uses identical bf16/f32 numerics.
    ref_matched = _reference_forward_matched(x, padded_params, dim)
    assert jnp.allclose(out, ref_matched, atol=1e-3, rtol=1e-3)

    # Loose check vs. the pure-f32 reference (bf16 weight rounding only).
    ref_f32 = _reference_forward_f32(x, raw_params)
    assert jnp.allclose(out, ref_f32, atol=3e-2, rtol=3e-2)

    print("KERNEL_OK")
</pallas_src>

<mosaic_0001>
module attributes {stable_mosaic.version = 11 : i64} {
  func.func @kernel(%arg0: i32, %arg1: memref<256x5xf32, #tpu.memory_space<vmem>>, %arg2: memref<5x128xbf16, #tpu.memory_space<vmem>>, %arg3: memref<1x128xf32, #tpu.memory_space<vmem>>, %arg4: memref<128x128xbf16, #tpu.memory_space<vmem>>, %arg5: memref<1x128xf32, #tpu.memory_space<vmem>>, %arg6: memref<128x128xbf16, #tpu.memory_space<vmem>>, %arg7: memref<1x128xf32, #tpu.memory_space<vmem>>, %arg8: memref<256x128xf32, #tpu.memory_space<vmem>>) attributes {dimension_semantics = [#tpu.dimension_semantics<parallel>], iteration_bounds = array<i64: 2>, scalar_prefetch = 0 : i64, scratch_operands = 0 : i64, tpu.core_type = #tpu.core_type<tc>, window_params = [{transform_indices = @transform_0, window_bounds = array<i64: 256, 5>}, {pipeline_mode = #tpu.pipeline_mode<synchronous>, transform_indices = @transform_1, window_bounds = array<i64: 5, 128>}, {pipeline_mode = #tpu.pipeline_mode<synchronous>, transform_indices = @transform_2, window_bounds = array<i64: 1, 128>}, {pipeline_mode = #tpu.pipeline_mode<synchronous>, transform_indices = @transform_3, window_bounds = array<i64: 128, 128>}, {pipeline_mode = #tpu.pipeline_mode<synchronous>, transform_indices = @transform_4, window_bounds = array<i64: 1, 128>}, {pipeline_mode = #tpu.pipeline_mode<synchronous>, transform_indices = @transform_5, window_bounds = array<i64: 128, 128>}, {pipeline_mode = #tpu.pipeline_mode<synchronous>, transform_indices = @transform_6, window_bounds = array<i64: 1, 128>}, {transform_indices = @transform_7, window_bounds = array<i64: 256, 128>}]} {
    %c0 = arith.constant 0 : index
    %c0_0 = arith.constant 0 : index
    %0 = vector.load %arg1[%c0, %c0_0] : memref<256x5xf32, #tpu.memory_space<vmem>>, vector<256x5xf32>
    %c0_1 = arith.constant 0 : index
    %c0_2 = arith.constant 0 : index
    %1 = vector.load %arg2[%c0_1, %c0_2] : memref<5x128xbf16, #tpu.memory_space<vmem>>, vector<5x128xbf16>
    %c0_3 = arith.constant 0 : index
    %c0_4 = arith.constant 0 : index
    %2 = vector.load %arg3[%c0_3, %c0_4] : memref<1x128xf32, #tpu.memory_space<vmem>>, vector<1x128xf32>
    %3 = arith.truncf %0 : vector<256x5xf32> to vector<256x5xbf16>
    %cst = arith.constant dense<0.000000e+00> : vector<256x128xf32>
    %4 = tpu.matmul %3, %1, %cst {dimension_numbers = #tpu.dot_dimension_numbers<[1], [0], [0], [1], [0, 0, 1, 1], [], []>} : vector<256x5xbf16>, vector<5x128xbf16>, vector<256x128xf32> -> vector<256x128xf32>
    %5 = vector.broadcast %2 : vector<1x128xf32> to vector<256x128xf32>
    %6 = arith.addf %4, %5 : vector<256x128xf32>
    %cst_5 = arith.constant 0.000000e+00 : f32
    %7 = vector.broadcast %cst_5 : f32 to vector<256x128xf32>
    %8 = arith.maximumf %6, %7 : vector<256x128xf32>
    %c0_6 = arith.constant 0 : index
    %c0_7 = arith.constant 0 : index
    %9 = vector.load %arg4[%c0_6, %c0_7] : memref<128x128xbf16, #tpu.memory_space<vmem>>, vector<128x128xbf16>
    %c0_8 = arith.constant 0 : index
    %c0_9 = arith.constant 0 : index
    %10 = vector.load %arg5[%c0_8, %c0_9] : memref<1x128xf32, #tpu.memory_space<vmem>>, vector<1x128xf32>
    %11 = arith.truncf %8 : vector<256x128xf32> to vector<256x128xbf16>
    %cst_10 = arith.constant dense<0.000000e+00> : vector<256x128xf32>
    %12 = tpu.matmul %11, %9, %cst_10 {dimension_numbers = #tpu.dot_dimension_numbers<[1], [0], [0], [1], [0, 0, 1, 1], [], []>} : vector<256x128xbf16>, vector<128x128xbf16>, vector<256x128xf32> -> vector<256x128xf32>
    %13 = vector.broadcast %10 : vector<1x128xf32> to vector<256x128xf32>
    %14 = arith.addf %12, %13 : vector<256x128xf32>
    %cst_11 = arith.constant 0.000000e+00 : f32
    %15 = vector.broadcast %cst_11 : f32 to vector<256x128xf32>
    %16 = arith.maximumf %14, %15 : vector<256x128xf32>
    %c0_12 = arith.constant 0 : index
    %c0_13 = arith.constant 0 : index
    %17 = vector.load %arg6[%c0_12, %c0_13] : memref<128x128xbf16, #tpu.memory_space<vmem>>, vector<128x128xbf16>
    %c0_14 = arith.constant 0 : index
    %c0_15 = arith.constant 0 : index
    %18 = vector.load %arg7[%c0_14, %c0_15] : memref<1x128xf32, #tpu.memory_space<vmem>>, vector<1x128xf32>
    %19 = arith.truncf %16 : vector<256x128xf32> to vector<256x128xbf16>
    %cst_16 = arith.constant dense<0.000000e+00> : vector<256x128xf32>
    %20 = tpu.matmul %19, %17, %cst_16 {dimension_numbers = #tpu.dot_dimension_numbers<[1], [0], [0], [1], [0, 0, 1, 1], [], []>} : vector<256x128xbf16>, vector<128x128xbf16>, vector<256x128xf32> -> vector<256x128xf32>
    %21 = vector.broadcast %18 : vector<1x128xf32> to vector<256x128xf32>
    %22 = arith.addf %20, %21 : vector<256x128xf32>
    %c0_17 = arith.constant 0 : index
    %c0_18 = arith.constant 0 : index
    %23 = vector.load %arg8[%c0_17, %c0_18] : memref<256x128xf32, #tpu.memory_space<vmem>>, vector<256x128xf32>
    tpu.vector_store %arg8[%c0_17, %c0_18], %22 {strides = array<i32>} : memref<256x128xf32, #tpu.memory_space<vmem>>, vector<256x128xf32>,
    return
  }
  func.func @transform_0(%arg0: i32) -> (i32, i32) {
    %c0_i32 = arith.constant 0 : i32
    %c0_i32_0 = arith.constant 0 : i32
    return %arg0, %c0_i32 : i32, i32
  }
  func.func @transform_1(%arg0: i32) -> (i32, i32) {
    %c0_i32 = arith.constant 0 : i32
    %c0_i32_0 = arith.constant 0 : i32
    %c0_i32_1 = arith.constant 0 : i32
    return %c0_i32, %c0_i32_0 : i32, i32
  }
  func.func @transform_2(%arg0: i32) -> (i32, i32) {
    %c0_i32 = arith.constant 0 : i32
    %c0_i32_0 = arith.constant 0 : i32
    %c0_i32_1 = arith.constant 0 : i32
    return %c0_i32, %c0_i32_0 : i32, i32
  }
  func.func @transform_3(%arg0: i32) -> (i32, i32) {
    %c0_i32 = arith.constant 0 : i32
    %c0_i32_0 = arith.constant 0 : i32
    %c0_i32_1 = arith.constant 0 : i32
    return %c0_i32, %c0_i32_0 : i32, i32
  }
  func.func @transform_4(%arg0: i32) -> (i32, i32) {
    %c0_i32 = arith.constant 0 : i32
    %c0_i32_0 = arith.constant 0 : i32
    %c0_i32_1 = arith.constant 0 : i32
    return %c0_i32, %c0_i32_0 : i32, i32
  }
  func.func @transform_5(%arg0: i32) -> (i32, i32) {
    %c0_i32 = arith.constant 0 : i32
    %c0_i32_0 = arith.constant 0 : i32
    %c0_i32_1 = arith.constant 0 : i32
    return %c0_i32, %c0_i32_0 : i32, i32
  }
  func.func @transform_6(%arg0: i32) -> (i32, i32) {
    %c0_i32 = arith.constant 0 : i32
    %c0_i32_0 = arith.constant 0 : i32
    %c0_i32_1 = arith.constant 0 : i32
    return %c0_i32, %c0_i32_0 : i32, i32
  }
  func.func @transform_7(%arg0: i32) -> (i32, i32) {
    %c0_i32 = arith.constant 0 : i32
    %c0_i32_0 = arith.constant 0 : i32
    return %arg0, %c0_i32 : i32, i32
  }
}

</mosaic_0001>

<bundles_post_ra>
// kernel: flow_mlp_forward.1
= control target key start
LH: loop header
LB: loop body
LE: loop exit
PB: predicated region body
PF: predicated region fallthrough
CT: control target
= control target key end

     0   :  { %s1521_s24 = smov 0   ;;  %s1806_s0 = inlined_call_operand.vmem [shape: f32[512,5], index: 0, kind: input, shape index: {}]   ;;  %s1807_s1 = inlined_call_operand.vmem [shape: bf16[5,128], index: 1, kind: input, shape index: {}]   ;;  %s1808_s2 = inlined_call_operand.vmem [shape: f32[1,128], index: 2, kind: input, shape index: {}]   ;;  %s1809_s3 = inlined_call_operand.vmem [shape: bf16[128,128], index: 3, kind: input, shape index: {}]   ;;  %s1810_s4 = inlined_call_operand.vmem [shape: f32[1,128], index: 4, kind: input, shape index: {}]   ;;  %s1811_s5 = inlined_call_operand.vmem [shape: bf16[128,128], index: 5, kind: input, shape index: {}]   ;;  %s1812_s6 = inlined_call_operand.vmem [shape: f32[1,128], index: 6, kind: input, shape index: {}]   ;;  %s1813_s7 = inlined_call_operand.vmem [shape: f32[512,128], index: 7, kind: output, shape index: {}]  }
   0x1 LB: > { %s1204_s25 = sadd.s32 4294967295, %s1478_s24   ;;  %p1208_p0 = scmp.ge.s32.totalorder %s1478_s24, 1  ;;  %s1478_s24 = sphi %s1521_s24, %s17_s24  }
   0x2   : > { %p238_p1 = scmp.lt.s32.totalorder %s1478_s24, 3 }
   0x4   : > { %p239_p2 = pnand %p1208_p0, %p238_p1 }
   0x5   : > { %s1209_s28 = sshll.u32 (!%p239_p2), %s1204_s25, 5 }
   0x6   : > { %242 = sbr.rel (%p239_p2) target bundleno = 690 (0x2b2), region = 48  ;;  %p271_p3 = scmp.lt.s32.totalorder (!%p239_p2), %s1209_s28, 63 }
   0xb   : > { %v315_v0 = vld [vmem:[%s1807_s1] sm:$0x7]  ;;  %vm388_vm0 = vcmask 1041408   ;;  %vm389_vm1 = vcmask 1042432   ;;  %v1480_v1 = vmov 65535   ;;  %s1815_s28 = smov (!%p271_p3, %s1209_s28), 63 }
   0xc   : > { %v390_v2 = vsel %vm388_vm0, 4294967295, %v1480_v1  ;;  %v1456_v5 = vld [vmem:[%s1809_s3 + $0x38] sm:$0xff]   ;;  %s1210_s8 = sshll.u32 %s1815_s28, 3  ;;  %vm339_vm2 = vcmask 39936   ;;  %v1457_v27 = vld [vmem:[%s1809_s3 + $0x30] sm:$0xff]   ;;  %v1458_v33 = vld [vmem:[%s1809_s3 + $0x28] sm:$0xff]  }
   0xd   : > { %v391_v3 = vsel %vm389_vm1, %v390_v2, 0  ;;  %s1543_s11 = scalar_lea.vmem %s1806_s0, %s1210_s8  ;;  %v1459_v41 = vld [vmem:[%s1809_s3 + $0x20] sm:$0xff]   ;;  %v1460_v49 = vld [vmem:[%s1809_s3 + $0x18] sm:$0xff]   ;;  %v1461_v58 = vld [vmem:[%s1809_s3 + $0x10] sm:$0xff]   ;;  %s1737_s10 = scalar_lea.vmem %s1813_s7, %s1210_s8 }
   0xe   : > { %v393_v4 = vand.u32 %v391_v3, %v315_v0  ;;  %v283_v6 = vld [vmem:[%s1543_s11] sm:$0xff]  ;;  %v284_v7 = vld [vmem:[%s1543_s11 + $0x8] sm:$0xff]  ;;  %v285_v8 = vld [vmem:[%s1543_s11 + $0x10] sm:$0xff] }
   0xf   : > { %v317_v9 = vpack.c.bf16 %v284_v7, %v283_v6  ;;  %v286_v10 = vld [vmem:[%s1543_s11 + $0x18] sm:$0xff]  ;;  %v287_v11 = vld [vmem:[%s1543_s11 + $0x20] sm:$0xff]  ;;  %v288_v12 = vld [vmem:[%s1543_s11 + $0x28] sm:$0xff] }
  0x10   : > { %1315 = vmatprep.subr.bf16.mxu0 %v393_v4  ;;  %1445 = vmatprep.subr.bf16.mxu1 %v393_v4  ;;  %v318_v13 = vpack.c.bf16 %v286_v10, %v285_v8  ;;  %v319_v14 = vpack.c.bf16 %v288_v12, %v287_v11  ;;  %v289_v15 = vld [vmem:[%s1543_s11 + $0x30] sm:$0xff]  ;;  %v290_v16 = vld [vmem:[%s1543_s11 + $0x38] sm:$0xff]  ;;  %v291_v17 = vld [vmem:[%s1543_s11 + $0x40] sm:$0xff] }
  0x11   : > { %1316 = vmatpush3.bf16.msra.mxu0 %v393_v4  ;;  %1446 = vmatpush3.bf16.msra.mxu1 %v393_v4  ;;  %v292_v18 = vld [vmem:[%s1543_s11 + $0x48] sm:$0xff]  ;;  %v299_v19 = vld [vmem:[%s1543_s11 + $0x80] sm:$0xff]  ;;  %v301_v22 = vld [vmem:[%s1543_s11 + $0x90] sm:$0xff]  ;;  %v320_v28 = vpack.c.bf16 %v290_v16, %v289_v15 }
  0x12   : > { %1349 = vmatprep.subr.bf16.mxu1 %v1456_v5  ;;  %1317 = vmatprep.mubr.msk.bf16.mxu0 %vm339_vm2, %v317_v9  ;;  %v300_v20 = vld [vmem:[%s1543_s11 + $0x88] sm:$0xff]  ;;  %v302_v23 = vld [vmem:[%s1543_s11 + $0x98] sm:$0xff]  ;;  %v303_v24 = vld [vmem:[%s1543_s11 + $0xa0] sm:$0xff]  ;;  %v321_v30 = vpack.c.bf16 %v292_v18, %v291_v17 }
  0x13   : > { %v325_v21 = vpack.c.bf16 %v300_v20, %v299_v19  ;;  %v326_v25 = vpack.c.bf16 %v302_v23, %v301_v22  ;;  %v304_v26 = vld [vmem:[%s1543_s11 + $0xa8] sm:$0xff]  ;;  %v305_v31 = vld [vmem:[%s1543_s11 + $0xb0] sm:$0xff]  ;;  %v306_v32 = vld [vmem:[%s1543_s11 + $0xb8] sm:$0xff] }
  0x14   : > { %1318 = vmatmul.mubr.msk.bf16.vlgmr.msra.gmra.mxu0 %vm339_vm2, %v318_v13  ;;  %v327_v29 = vpack.c.bf16 %v304_v26, %v303_v24  ;;  %v307_v34 = vld [vmem:[%s1543_s11 + $0xc0] sm:$0xff]  ;;  %v308_v35 = vld [vmem:[%s1543_s11 + $0xc8] sm:$0xff]  ;;  %v293_v36 = vld [vmem:[%s1543_s11 + $0x50] sm:$0xff]  ;;  %v328_v40 = vpack.c.bf16 %v306_v32, %v305_v31 }
  0x15   : > { %1321 = vmatprep.mubr.msk.bf16.mxu0 %vm339_vm2, %v319_v14  ;;  %1333 = vmatprep.mubr.msk.bf16.mxu1 %vm339_vm2, %v325_v21  ;;  %v294_v37 = vld [vmem:[%s1543_s11 + $0x58] sm:$0xff]  ;;  %v295_v38 = vld [vmem:[%s1543_s11 + $0x60] sm:$0xff]  ;;  %v296_v39 = vld [vmem:[%s1543_s11 + $0x68] sm:$0xff]  ;;  %v329_v42 = vpack.c.bf16 %v308_v35, %v307_v34 }
  0x16   : > { %1334 = vmatmul.mubr.msk.bf16.vlgmr.msra.gmra.mxu1 %vm339_vm2, %v326_v25  ;;  %v322_v43 = vpack.c.bf16 %v294_v37, %v293_v36  ;;  %v323_v44 = vpack.c.bf16 %v296_v39, %v295_v38  ;;  %v309_v45 = vld [vmem:[%s1543_s11 + $0xd0] sm:$0xff]  ;;  %v310_v46 = vld [vmem:[%s1543_s11 + $0xd8] sm:$0xff]  ;;  %v311_v47 = vld [vmem:[%s1543_s11 + $0xe0] sm:$0xff] }
  0x17   : > { %1337 = vmatprep.mubr.msk.bf16.mxu1 %vm339_vm2, %v327_v29  ;;  %1350 = vmatpush3.bf16.msra.mxu1 %v1456_v5  ;;  %v312_v48 = vld [vmem:[%s1543_s11 + $0xe8] sm:$0xff]  ;;  %v297_v50 = vld [vmem:[%s1543_s11 + $0x70] sm:$0xff]  ;;  %v298_v51 = vld [vmem:[%s1543_s11 + $0x78] sm:$0xff]  ;;  %v330_v52 = vpack.c.bf16 %v310_v46, %v309_v45 }
  0x18   : > { %1351 = vmatprep.subr.bf16.mxu1 %v1457_v27  ;;  %v331_v53 = vpack.c.bf16 %v312_v48, %v311_v47  ;;  %v324_v54 = vpack.c.bf16 %v298_v51, %v297_v50  ;;  %v313_v55 = vld [vmem:[%s1543_s11 + $0xf0] sm:$0xff]  ;;  %v314_v56 = vld [vmem:[%s1543_s11 + $0xf8] sm:$0xff]  ;;  %v1462_v59 = vld [vmem:[%s1809_s3 + $0x8] sm:$0xff]  }
  0x19   : > { %v332_v57 = vpack.c.bf16 %v314_v56, %v313_v55  ;;  %v1463_v60 = vld [vmem:[%s1809_s3] sm:$0xff]   ;;  %v1464_v61 = vld [vmem:[%s1811_s5 + $0x38] sm:$0xff]   ;;  %v1465_v62 = vld [vmem:[%s1811_s5 + $0x30] sm:$0xff]  }
  0x1a   : > { %1397 = vmatprep.subr.bf16.mxu0 %v1464_v61  ;;  %v1466_v63 = vld [vmem:[%s1811_s5 + $0x28] sm:$0xff]   ;;  %v1467_v0 = vld [vmem:[%s1811_s5 + $0x20] sm:$0xff]   ;;  %v1468_v1 = vld [vmem:[%s1811_s5 + $0x18] sm:$0xff]  }
  0x1b   : > { %1352 = vmatpush3.bf16.msra.mxu1 %v1457_v27  ;;  %1398 = vmatpush3.bf16.msra.mxu0 %v1464_v61  ;;  %v1632_v4 = vld [vmem:[%s1808_s2] ss:$0 sm:$0xff] }
  0x1c   : > { %1322 = vmatmul.mubr.msk.bf16.gmra.mxu0 %vm339_vm2, %v320_v28  ;;  %1353 = vmatprep.subr.bf16.mxu1 %v1458_v33 }
  0x1d   : > { %1325 = vmatprep.mubr.msk.bf16.mxu0 %vm339_vm2, %v321_v30  ;;  %1399 = vmatprep.subr.bf16.mxu0 %v1465_v62 }
  0x1e   : > { %1338 = vmatmul.mubr.msk.bf16.gmra.mxu1 %vm339_vm2, %v328_v40 }
  0x1f   : > { %1341 = vmatprep.mubr.msk.bf16.mxu1 %vm339_vm2, %v329_v42  ;;  %1354 = vmatpush3.bf16.msra.mxu1 %v1458_v33 }
  0x20   : > { %1355 = vmatprep.subr.bf16.mxu1 %v1459_v41  ;;  %1400 = vmatpush3.bf16.msra.mxu0 %v1465_v62 }
  0x21   : > { %1401 = vmatprep.subr.bf16.mxu0 %v1466_v63 }
  0x23   : > { %1356 = vmatpush3.bf16.msra.mxu1 %v1459_v41 }
  0x24   : > { %1326 = vmatmul.mubr.msk.bf16.gmra.mxu0 %vm339_vm2, %v322_v43  ;;  %1357 = vmatprep.subr.bf16.mxu1 %v1460_v49 }
  0x25   : > { %1329 = vmatprep.mubr.msk.bf16.mxu0 %vm339_vm2, %v323_v44  ;;  %1402 = vmatpush3.bf16.msra.mxu0 %v1466_v63 }
  0x26   : > { %1342 = vmatmul.mubr.msk.bf16.gmra.mxu1 %vm339_vm2, %v330_v52  ;;  %1403 = vmatprep.subr.bf16.mxu0 %v1467_v0 }
  0x27   : > { %1345 = vmatprep.mubr.msk.bf16.mxu1 %vm339_vm2, %v331_v53  ;;  %1358 = vmatpush3.bf16.msra.mxu1 %v1460_v49 }
  0x28   : > { %1359 = vmatprep.subr.bf16.mxu1 %v1461_v58 }
  0x29   : > { %1404 = vmatpush3.bf16.msra.mxu0 %v1467_v0 }
  0x2a   : > { %1405 = vmatprep.subr.bf16.mxu0 %v1468_v1 }
  0x2b   : > { %1360 = vmatpush3.bf16.msra.mxu1 %v1461_v58 }
  0x2c   : > { %1330 = vmatmul.mubr.msk.bf16.gmra.mxu0 %vm339_vm2, %v324_v54  ;;  %1361 = vmatprep.subr.bf16.mxu1 %v1462_v59 }
  0x2d   : > { %1406 = vmatpush3.bf16.msra.mxu0 %v1468_v1 }
  0x2e   : > { %1346 = vmatmul.mubr.msk.bf16.gmra.mxu1 %vm339_vm2, %v332_v57 }
  0x2f   : > { %1362 = vmatpush3.bf16.msra.mxu1 %v1462_v59 }
  0x30   : > { %1363 = vmatprep.subr.bf16.mxu1 %v1463_v60 }
  0x33   : > { %1364 = vmatpush3.bf16.msra.mxu1 %v1463_v60 }
  0xd4   : > { %v1319_v2 = vpop.f32.mrf.mxu0 }
  0xd5   : > { %v438_v9 = vadd.f32 %v1319_v2, %v1632_v4 }
  0xd6   : > { %v429_v3 = vpop.f32.mrf.mxu0  ;;  %v1636_v8 = vpop.f32.mrf.mxu1 }
  0xd7   : > { %v430_v6 = vadd.f32 %v1632_v4, %v429_v3  ;;  %v558_v18 = vmax.f32 %v438_v9, 0.0 }
  0xd8   : > { %v1320_v5 = vpop.f32.mrf.mxu0  ;;  %v493_v12 = vpop.f32.mrf.mxu1 }
  0xd9   : > { %v441_v7 = vadd.f32 %v1320_v5, %v1632_v4  ;;  %v556_v15 = vmax.f32 %v430_v6, 0.0  ;;  %v494_v56 = vadd.f32 %v1632_v4, %v493_v12 }
  0xda   : > { %v432_v10 = vpop.f32.mrf.mxu0  ;;  %v1640_v17 = vpop.f32.mrf.mxu1 }
  0xdb   : > { %v433_v11 = vadd.f32 %v1632_v4, %v432_v10  ;;  %v559_v13 = vmax.f32 %v441_v7, 0.0  ;;  %v572_v1 = vmax.f32 %v494_v56, 0.0  ;;  %v1693_v56 = vld [vmem:[%s1810_s4] ss:$0 sm:$0xff] }
  0xdc   : > { %v1323_v14 = vpop.f32.mrf.mxu0  ;;  %v496_v21 = vpop.f32.mrf.mxu1 }
  0xdd   : > { %v557_v16 = vmax.f32 %v433_v11, 0.0  ;;  %v606_v22 = vpack.c.bf16 %v559_v13, %v558_v18  ;;  %v454_v27 = vadd.f32 %v1323_v14, %v1632_v4  ;;  %v497_v57 = vadd.f32 %v1632_v4, %v496_v21 }
  0xde   : > { %v445_v19 = vpop.f32.mrf.mxu0  ;;  %v1644_v26 = vpop.f32.mrf.mxu1  ;;  %v505_v18 = vadd.f32 %v1640_v17, %v1632_v4 }
  0xdf   : > { %v605_v20 = vpack.c.bf16 %v557_v16, %v556_v15  ;;  %v446_v24 = vadd.f32 %v1632_v4, %v445_v19  ;;  %v562_v36 = vmax.f32 %v454_v27, 0.0  ;;  %v573_v3 = vmax.f32 %v497_v57, 0.0 }
  0xe0   : > { %v1324_v23 = vpop.f32.mrf.mxu0  ;;  %v509_v30 = vpop.f32.mrf.mxu1  ;;  %v502_v15 = vadd.f32 %v1636_v8, %v1632_v4  ;;  %v518_v8 = vadd.f32 %v1644_v26, %v1632_v4 }
  0xe1   : > { %v457_v25 = vadd.f32 %v1324_v23, %v1632_v4  ;;  %1365 = vmatprep.mubr.bf16.mxu1 %v605_v20  ;;  %v560_v33 = vmax.f32 %v446_v24, 0.0  ;;  %v613_v12 = vpack.c.bf16 %v573_v3, %v572_v1  ;;  %v510_v13 = vadd.f32 %v1632_v4, %v509_v30 }
  0xe2   : > { %v448_v28 = vpop.f32.mrf.mxu0  ;;  %1366 = vmatmul.mubr.bf16.vlgmr.msra.gmra.mxu1 %v606_v22  ;;  %v1648_v35 = vpop.f32.mrf.mxu1  ;;  %v574_v22 = vmax.f32 %v502_v15, 0.0  ;;  %v575_v23 = vmax.f32 %v505_v18, 0.0 }
  0xe3   : > { %v449_v29 = vadd.f32 %v1632_v4, %v448_v28  ;;  %v563_v31 = vmax.f32 %v457_v25, 0.0  ;;  %v576_v20 = vmax.f32 %v510_v13, 0.0  ;;  %v521_v17 = vadd.f32 %v1648_v35, %v1632_v4 }
  0xe4   : > { %v1327_v32 = vpop.f32.mrf.mxu0  ;;  %v512_v39 = vpop.f32.mrf.mxu1 }
  0xe5   : > { %v561_v34 = vmax.f32 %v449_v29, 0.0  ;;  %v608_v40 = vpack.c.bf16 %v563_v31, %v562_v36  ;;  %v470_v45 = vadd.f32 %v1327_v32, %v1632_v4  ;;  %v513_v14 = vadd.f32 %v1632_v4, %v512_v39 }
  0xe6   : > { %v461_v37 = vpop.f32.mrf.mxu0  ;;  %v1652_v44 = vpop.f32.mrf.mxu1  ;;  %v614_v29 = vpack.c.bf16 %v575_v23, %v574_v22 }
  0xe7   : > { %v607_v38 = vpack.c.bf16 %v561_v34, %v560_v33  ;;  %v462_v42 = vadd.f32 %v1632_v4, %v461_v37  ;;  %v566_v53 = vmax.f32 %v470_v45, 0.0  ;;  %v577_v21 = vmax.f32 %v513_v14, 0.0 }
  0xe8   : > { %v1328_v41 = vpop.f32.mrf.mxu0  ;;  %v525_v50 = vpop.f32.mrf.mxu1  ;;  %v578_v33 = vmax.f32 %v518_v8, 0.0  ;;  %v579_v34 = vmax.f32 %v521_v17, 0.0  ;;  %v534_v26 = vadd.f32 %v1652_v44, %v1632_v4  ;;  %v1469_v44 = vld [vmem:[%s1811_s5 + $0x10] sm:$0xff]  }
  0xe9   : > { %v473_v43 = vadd.f32 %v1328_v41, %v1632_v4  ;;  %1369 = vmatprep.mubr.bf16.mxu1 %v607_v38  ;;  %v564_v51 = vmax.f32 %v462_v42, 0.0  ;;  %v615_v25 = vpack.c.bf16 %v577_v21, %v576_v20  ;;  %v526_v27 = vadd.f32 %v1632_v4, %v525_v50  ;;  %1407 = vmatprep.subr.bf16.mxu0 %v1469_v44 }
  0xea   : > { %v464_v46 = vpop.f32.mrf.mxu0  ;;  %1370 = vmatmul.mubr.bf16.gmra.mxu1 %v608_v40  ;;  %v1344_v60 = vpop.f32.mrf.mxu1  ;;  %v616_v40 = vpack.c.bf16 %v579_v34, %v578_v33  ;;  %1408 = vmatpush3.bf16.msra.mxu0 %v1469_v44 }
  0xeb   : > { %v465_v47 = vadd.f32 %v1632_v4, %v464_v46  ;;  %v567_v48 = vmax.f32 %v473_v43, 0.0  ;;  %v580_v31 = vmax.f32 %v526_v27, 0.0  ;;  %v537_v41 = vadd.f32 %v1344_v60, %v1632_v4 }
  0xec   : > { %v1331_v49 = vpop.f32.mrf.mxu0  ;;  %v528_v6 = vpop.f32.mrf.mxu1  ;;  %v582_v43 = vmax.f32 %v534_v26, 0.0 }
  0xed   : > { %v565_v52 = vmax.f32 %v465_v47, 0.0  ;;  %v610_v58 = vpack.c.bf16 %v567_v48, %v566_v53  ;;  %v486_v63 = vadd.f32 %v1331_v49, %v1632_v4  ;;  %v529_v28 = vadd.f32 %v1632_v4, %v528_v6  ;;  %v1470_v53 = vld [vmem:[%s1811_s5 + $0x8] sm:$0xff]  }
  0xee   : > { %v477_v54 = vpop.f32.mrf.mxu0  ;;  %v1347_v19 = vpop.f32.mrf.mxu1  ;;  %v583_v45 = vmax.f32 %v537_v41, 0.0  ;;  %1409 = vmatprep.subr.bf16.mxu0 %v1470_v53 }
  0xef   : > { %v609_v55 = vpack.c.bf16 %v565_v52, %v564_v51  ;;  %v478_v61 = vadd.f32 %v1632_v4, %v477_v54  ;;  %v570_v10 = vmax.f32 %v486_v63, 0.0  ;;  %v581_v32 = vmax.f32 %v529_v28, 0.0  ;;  %1410 = vmatpush3.bf16.msra.mxu0 %v1470_v53 }
  0xf0   : > { %v1332_v59 = vpop.f32.mrf.mxu0  ;;  %v541_v24 = vpop.f32.mrf.mxu1  ;;  %v618_v47 = vpack.c.bf16 %v583_v45, %v582_v43  ;;  %v550_v48 = vadd.f32 %v1347_v19, %v1632_v4 }
  0xf1   : > { %v489_v62 = vadd.f32 %v1332_v59, %v1632_v4  ;;  %1373 = vmatprep.mubr.bf16.mxu1 %v609_v55  ;;  %v568_v7 = vmax.f32 %v478_v61, 0.0  ;;  %v617_v37 = vpack.c.bf16 %v581_v32, %v580_v31  ;;  %v542_v38 = vadd.f32 %v1632_v4, %v541_v24 }
  0xf2   : > { %v480_v0 = vpop.f32.mrf.mxu0  ;;  %1374 = vmatmul.mubr.bf16.gmra.mxu1 %v610_v58  ;;  %v1348_v30 = vpop.f32.mrf.mxu1  ;;  %v586_v50 = vmax.f32 %v550_v48, 0.0 }
  0xf3   : > { %v481_v2 = vadd.f32 %v1632_v4, %v480_v0  ;;  %v571_v5 = vmax.f32 %v489_v62, 0.0  ;;  %v584_v35 = vmax.f32 %v542_v38, 0.0  ;;  %v553_v49 = vadd.f32 %v1348_v30, %v1632_v4 }
  0xf4   : > { %v544_v36 = vpop.f32.mrf.mxu1 }
  0xf5   : > { %v569_v9 = vmax.f32 %v481_v2, 0.0  ;;  %v612_v16 = vpack.c.bf16 %v571_v5, %v570_v10  ;;  %v545_v39 = vadd.f32 %v1632_v4, %v544_v36  ;;  %v587_v51 = vmax.f32 %v553_v49, 0.0  ;;  %v1471_v4 = vld [vmem:[%s1811_s5] sm:$0xff]  }
  0xf6   : > { %1411 = vmatprep.subr.bf16.mxu0 %v1471_v4 }
  0xf7   : > { %v611_v11 = vpack.c.bf16 %v569_v9, %v568_v7  ;;  %v585_v42 = vmax.f32 %v545_v39, 0.0  ;;  %v620_v52 = vpack.c.bf16 %v587_v51, %v586_v50  ;;  %1412 = vmatpush3.bf16.msra.mxu0 %v1471_v4 }
  0xf9   : > { %1377 = vmatprep.mubr.bf16.mxu1 %v611_v11  ;;  %v619_v46 = vpack.c.bf16 %v585_v42, %v584_v35 }
  0xfa   : > { %1378 = vmatmul.mubr.bf16.gmra.mxu1 %v612_v16 }
  0xfb   : > { %1381 = vmatprep.mubr.bf16.mxu1 %v613_v12 }
 0x102   : > { %1382 = vmatmul.mubr.bf16.gmra.mxu1 %v614_v29 }
 0x103   : > { %1385 = vmatprep.mubr.bf16.mxu1 %v615_v25 }
 0x10a   : > { %1386 = vmatmul.mubr.bf16.gmra.mxu1 %v616_v40 }
 0x10b   : > { %1389 = vmatprep.mubr.bf16.mxu1 %v617_v37 }
 0x112   : > { %1390 = vmatmul.mubr.bf16.gmra.mxu1 %v618_v47 }
 0x113   : > { %1393 = vmatprep.mubr.bf16.mxu1 %v619_v46 }
 0x11a   : > { %1394 = vmatmul.mubr.bf16.gmra.mxu1 %v620_v52 }
 0x1a2   : > { %v1367_v54 = vpop.f32.mrf.mxu1 }
 0x1a3   : > { %v718_v60 = vadd.f32 %v1367_v54, %v1693_v56 }
 0x1a4   : > { %v709_v55 = vpop.f32.mrf.mxu1 }
 0x1a5   : > { %v710_v58 = vadd.f32 %v1693_v56, %v709_v55  ;;  %v838_v3 = vmax.f32 %v718_v60, 0.0 }
 0x1a6   : > { %v1368_v57 = vpop.f32.mrf.mxu1 }
 0x1a7   : > { %v721_v59 = vadd.f32 %v1368_v57, %v1693_v56  ;;  %v836_v1 = vmax.f32 %v710_v58, 0.0 }
 0x1a8   : > { %v712_v61 = vpop.f32.mrf.mxu1 }
 0x1a9   : > { %v713_v62 = vadd.f32 %v1693_v56, %v712_v61  ;;  %v839_v63 = vmax.f32 %v721_v59, 0.0 }
 0x1aa   : > { %v1371_v0 = vpop.f32.mrf.mxu1 }
 0x1ab   : > { %v837_v2 = vmax.f32 %v713_v62, 0.0  ;;  %v886_v7 = vpack.c.bf16 %v839_v63, %v838_v3  ;;  %v734_v12 = vadd.f32 %v1371_v0, %v1693_v56 }
 0x1ac   : > { %v725_v5 = vpop.f32.mrf.mxu1 }
 0x1ad   : > { %v885_v6 = vpack.c.bf16 %v837_v2, %v836_v1  ;;  %v726_v10 = vadd.f32 %v1693_v56, %v725_v5  ;;  %v842_v20 = vmax.f32 %v734_v12, 0.0 }
 0x1ae   : > { %v1372_v9 = vpop.f32.mrf.mxu1 }
 0x1af   : > { %v737_v11 = vadd.f32 %v1372_v9, %v1693_v56  ;;  %1413 = vmatprep.mubr.bf16.mxu0 %v885_v6  ;;  %v840_v18 = vmax.f32 %v726_v10, 0.0 }
 0x1b0   : > { %v728_v13 = vpop.f32.mrf.mxu1  ;;  %1414 = vmatmul.mubr.bf16.vlgmr.msra.gmra.mxu0 %v886_v7 }
 0x1b1   : > { %v729_v14 = vadd.f32 %v1693_v56, %v728_v13  ;;  %v843_v15 = vmax.f32 %v737_v11, 0.0 }
 0x1b2   : > { %v1375_v16 = vpop.f32.mrf.mxu1 }
 0x1b3   : > { %v841_v19 = vmax.f32 %v729_v14, 0.0  ;;  %v888_v23 = vpack.c.bf16 %v843_v15, %v842_v20  ;;  %v750_v28 = vadd.f32 %v1375_v16, %v1693_v56 }
 0x1b4   : > { %v741_v21 = vpop.f32.mrf.mxu1 }
 0x1b5   : > { %v887_v22 = vpack.c.bf16 %v841_v19, %v840_v18  ;;  %v742_v25 = vadd.f32 %v1693_v56, %v741_v21  ;;  %v846_v33 = vmax.f32 %v750_v28, 0.0 }
 0x1b6   : > { %v1376_v24 = vpop.f32.mrf.mxu1 }
 0x1b7   : > { %v753_v27 = vadd.f32 %v1376_v24, %v1693_v56  ;;  %1417 = vmatprep.mubr.bf16.mxu0 %v887_v22  ;;  %v844_v31 = vmax.f32 %v742_v25, 0.0 }
 0x1b8   : > { %v744_v29 = vpop.f32.mrf.mxu1  ;;  %1418 = vmatmul.mubr.bf16.gmra.mxu0 %v888_v23 }
 0x1b9   : > { %v745_v8 = vadd.f32 %v1693_v56, %v744_v29  ;;  %v847_v17 = vmax.f32 %v753_v27, 0.0 }
 0x1ba   : > { %v1379_v30 = vpop.f32.mrf.mxu1 }
 0x1bb   : > { %v845_v32 = vmax.f32 %v745_v8, 0.0  ;;  %v890_v37 = vpack.c.bf16 %v847_v17, %v846_v33  ;;  %v766_v26 = vadd.f32 %v1379_v30, %v1693_v56 }
 0x1bc   : > { %v757_v34 = vpop.f32.mrf.mxu1 }
 0x1bd   : > { %v889_v36 = vpack.c.bf16 %v845_v32, %v844_v31  ;;  %v758_v39 = vadd.f32 %v1693_v56, %v757_v34  ;;  %v850_v47 = vmax.f32 %v766_v26, 0.0 }
 0x1be   : > { %v1380_v38 = vpop.f32.mrf.mxu1 }
 0x1bf   : > { %v769_v40 = vadd.f32 %v1380_v38, %v1693_v56  ;;  %1421 = vmatprep.mubr.bf16.mxu0 %v889_v36  ;;  %v848_v45 = vmax.f32 %v758_v39, 0.0 }
 0x1c0   : > { %v760_v41 = vpop.f32.mrf.mxu1  ;;  %1422 = vmatmul.mubr.bf16.gmra.mxu0 %v890_v37 }
 0x1c1   : > { %v761_v35 = vadd.f32 %v1693_v56, %v760_v41  ;;  %v851_v42 = vmax.f32 %v769_v40, 0.0 }
 0x1c2   : > { %v1383_v43 = vpop.f32.mrf.mxu1 }
 0x1c3   : > { %v849_v46 = vmax.f32 %v761_v35, 0.0  ;;  %v892_v50 = vpack.c.bf16 %v851_v42, %v850_v47  ;;  %v782_v53 = vadd.f32 %v1383_v43, %v1693_v56  ;;  %v1730_v35 = vld [vmem:[%s1812_s6] ss:$0 sm:$0xff] }
 0x1c4   : > { %v773_v48 = vpop.f32.mrf.mxu1 }
 0x1c5   : > { %v891_v49 = vpack.c.bf16 %v849_v46, %v848_v45  ;;  %v774_v52 = vadd.f32 %v1693_v56, %v773_v48  ;;  %v854_v60 = vmax.f32 %v782_v53, 0.0 }
 0x1c6   : > { %v1384_v51 = vpop.f32.mrf.mxu1 }
 0x1c7   : > { %v785_v44 = vadd.f32 %v1384_v51, %v1693_v56  ;;  %1425 = vmatprep.mubr.bf16.mxu0 %v891_v49  ;;  %v852_v58 = vmax.f32 %v774_v52, 0.0 }
 0x1c8   : > { %v776_v4 = vpop.f32.mrf.mxu1  ;;  %1426 = vmatmul.mubr.bf16.gmra.mxu0 %v892_v50 }
 0x1c9   : > { %v777_v54 = vadd.f32 %v1693_v56, %v776_v4  ;;  %v855_v55 = vmax.f32 %v785_v44, 0.0 }
 0x1ca   : > { %v1387_v57 = vpop.f32.mrf.mxu1 }
 0x1cb   : > { %v853_v59 = vmax.f32 %v777_v54, 0.0  ;;  %v894_v63 = vpack.c.bf16 %v855_v55, %v854_v60  ;;  %v798_v3 = vadd.f32 %v1387_v57, %v1693_v56 }
 0x1cc   : > { %v789_v61 = vpop.f32.mrf.mxu1 }
 0x1cd   : > { %v893_v62 = vpack.c.bf16 %v853_v59, %v852_v58  ;;  %v790_v1 = vadd.f32 %v1693_v56, %v789_v61  ;;  %v858_v12 = vmax.f32 %v798_v3, 0.0 }
 0x1ce   : > { %v1388_v0 = vpop.f32.mrf.mxu1 }
 0x1cf   : > { %v801_v2 = vadd.f32 %v1388_v0, %v1693_v56  ;;  %1429 = vmatprep.mubr.bf16.mxu0 %v893_v62  ;;  %v856_v10 = vmax.f32 %v790_v1, 0.0 }
 0x1d0   : > { %v792_v5 = vpop.f32.mrf.mxu1  ;;  %1430 = vmatmul.mubr.bf16.gmra.mxu0 %v894_v63 }
 0x1d1   : > { %v793_v6 = vadd.f32 %v1693_v56, %v792_v5  ;;  %v859_v7 = vmax.f32 %v801_v2, 0.0 }
 0x1d2   : > { %v1391_v9 = vpop.f32.mrf.mxu1 }
 0x1d3   : > { %v857_v11 = vmax.f32 %v793_v6, 0.0  ;;  %v896_v15 = vpack.c.bf16 %v859_v7, %v858_v12  ;;  %v814_v20 = vadd.f32 %v1391_v9, %v1693_v56 }
 0x1d4   : > { %v805_v13 = vpop.f32.mrf.mxu1 }
 0x1d5   : > { %v895_v14 = vpack.c.bf16 %v857_v11, %v856_v10  ;;  %v806_v18 = vadd.f32 %v1693_v56, %v805_v13  ;;  %v862_v28 = vmax.f32 %v814_v20, 0.0 }
 0x1d6   : > { %v1392_v16 = vpop.f32.mrf.mxu1 }
 0x1d7   : > { %v817_v19 = vadd.f32 %v1392_v16, %v1693_v56  ;;  %1433 = vmatprep.mubr.bf16.mxu0 %v895_v14  ;;  %v860_v25 = vmax.f32 %v806_v18, 0.0 }
 0x1d8   : > { %v808_v21 = vpop.f32.mrf.mxu1  ;;  %1434 = vmatmul.mubr.bf16.gmra.mxu0 %v896_v15 }
 0x1d9   : > { %v809_v22 = vadd.f32 %v1693_v56, %v808_v21  ;;  %v863_v23 = vmax.f32 %v817_v19, 0.0 }
 0x1da   : > { %v1395_v24 = vpop.f32.mrf.mxu1 }
 0x1db   : > { %v861_v27 = vmax.f32 %v809_v22, 0.0  ;;  %v898_v17 = vpack.c.bf16 %v863_v23, %v862_v28  ;;  %v830_v33 = vadd.f32 %v1395_v24, %v1693_v56 }
 0x1dc   : > { %v821_v29 = vpop.f32.mrf.mxu1 }
 0x1dd   : > { %v897_v8 = vpack.c.bf16 %v861_v27, %v860_v25  ;;  %v822_v31 = vadd.f32 %v1693_v56, %v821_v29  ;;  %v866_v40 = vmax.f32 %v830_v33, 0.0 }
 0x1de   : > { %v1396_v30 = vpop.f32.mrf.mxu1 }
 0x1df   : > { %v833_v32 = vadd.f32 %v1396_v30, %v1693_v56  ;;  %1437 = vmatprep.mubr.bf16.mxu0 %v897_v8  ;;  %v864_v38 = vmax.f32 %v822_v31, 0.0 }
 0x1e0   : > { %v824_v34 = vpop.f32.mrf.mxu1  ;;  %1438 = vmatmul.mubr.bf16.gmra.mxu0 %v898_v17 }
 0x1e1   : > { %v825_v36 = vadd.f32 %v1693_v56, %v824_v34  ;;  %v867_v37 = vmax.f32 %v833_v32, 0.0 }
 0x1e3   : > { %v865_v39 = vmax.f32 %v825_v36, 0.0  ;;  %v900_v41 = vpack.c.bf16 %v867_v37, %v866_v40 }
 0x1e5   : > { %v899_v26 = vpack.c.bf16 %v865_v39, %v864_v38 }
 0x1e7   : > { %1441 = vmatprep.mubr.bf16.mxu0 %v899_v26 }
 0x1e8   : > { %1442 = vmatmul.mubr.bf16.gmra.mxu0 %v900_v41 }
 0x270   : > { %v1415_v56 = vpop.f32.mrf.mxu0 }
 0x271   : > { %v998_v42 = vadd.f32 %v1415_v56, %v1730_v35 }
 0x272   : > { %v989_v43 = vpop.f32.mrf.mxu0 }
 0x273   : > { %1118 = vst [vmem:[%s1737_s10 + $0x10] sm:$0xff] %v998_v42  ;;  %v990_v45 = vadd.f32 %v1730_v35, %v989_v43 }
 0x274   : > { %v1416_v46 = vpop.f32.mrf.mxu0 }
 0x275   : > { %1116 = vst [vmem:[%s1737_s10] sm:$0xff] %v990_v45  ;;  %v1001_v47 = vadd.f32 %v1416_v46, %v1730_v35 }
 0x276   : > { %v992_v48 = vpop.f32.mrf.mxu0 }
 0x277   : > { %1119 = vst [vmem:[%s1737_s10 + $0x18] sm:$0xff] %v1001_v47  ;;  %v993_v49 = vadd.f32 %v1730_v35, %v992_v48 }
 0x278   : > { %v1419_v50 = vpop.f32.mrf.mxu0 }
 0x279   : > { %1117 = vst [vmem:[%s1737_s10 + $0x8] sm:$0xff] %v993_v49  ;;  %v1014_v51 = vadd.f32 %v1419_v50, %v1730_v35 }
 0x27a   : > { %v1005_v52 = vpop.f32.mrf.mxu0 }
 0x27b   : > { %1122 = vst [vmem:[%s1737_s10 + $0x30] sm:$0xff] %v1014_v51  ;;  %v1006_v44 = vadd.f32 %v1730_v35, %v1005_v52 }
 0x27c   : > { %v1420_v53 = vpop.f32.mrf.mxu0 }
 0x27d   : > { %1120 = vst [vmem:[%s1737_s10 + $0x20] sm:$0xff] %v1006_v44  ;;  %v1017_v4 = vadd.f32 %v1420_v53, %v1730_v35 }
 0x27e   : > { %v1008_v54 = vpop.f32.mrf.mxu0 }
 0x27f   : > { %1123 = vst [vmem:[%s1737_s10 + $0x38] sm:$0xff] %v1017_v4  ;;  %v1009_v55 = vadd.f32 %v1730_v35, %v1008_v54 }
 0x280   : > { %v1423_v57 = vpop.f32.mrf.mxu0 }
 0x281   : > { %1121 = vst [vmem:[%s1737_s10 + $0x28] sm:$0xff] %v1009_v55  ;;  %v1030_v58 = vadd.f32 %v1423_v57, %v1730_v35 }
 0x282   : > { %v1021_v59 = vpop.f32.mrf.mxu0 }
 0x283   : > { %1126 = vst [vmem:[%s1737_s10 + $0x50] sm:$0xff] %v1030_v58  ;;  %v1022_v60 = vadd.f32 %v1730_v35, %v1021_v59 }
 0x284   : > { %v1424_v61 = vpop.f32.mrf.mxu0 }
 0x285   : > { %1124 = vst [vmem:[%s1737_s10 + $0x40] sm:$0xff] %v1022_v60  ;;  %v1033_v62 = vadd.f32 %v1424_v61, %v1730_v35 }
 0x286   : > { %v1024_v63 = vpop.f32.mrf.mxu0 }
 0x287   : > { %1127 = vst [vmem:[%s1737_s10 + $0x58] sm:$0xff] %v1033_v62  ;;  %v1025_v0 = vadd.f32 %v1730_v35, %v1024_v63 }
 0x288   : > { %v1427_v1 = vpop.f32.mrf.mxu0 }
 0x289   : > { %1125 = vst [vmem:[%s1737_s10 + $0x48] sm:$0xff] %v1025_v0  ;;  %v1046_v2 = vadd.f32 %v1427_v1, %v1730_v35 }
 0x28a   : > { %v1037_v3 = vpop.f32.mrf.mxu0 }
 0x28b   : > { %1130 = vst [vmem:[%s1737_s10 + $0x70] sm:$0xff] %v1046_v2  ;;  %v1038_v5 = vadd.f32 %v1730_v35, %v1037_v3 }
 0x28c   : > { %v1428_v6 = vpop.f32.mrf.mxu0 }
 0x28d   : > { %1128 = vst [vmem:[%s1737_s10 + $0x60] sm:$0xff] %v1038_v5  ;;  %v1049_v7 = vadd.f32 %v1428_v6, %v1730_v35 }
 0x28e   : > { %v1040_v9 = vpop.f32.mrf.mxu0 }
 0x28f   : > { %1131 = vst [vmem:[%s1737_s10 + $0x78] sm:$0xff] %v1049_v7  ;;  %v1041_v10 = vadd.f32 %v1730_v35, %v1040_v9 }
 0x290   : > { %v1431_v11 = vpop.f32.mrf.mxu0 }
 0x291   : > { %1129 = vst [vmem:[%s1737_s10 + $0x68] sm:$0xff] %v1041_v10  ;;  %v1062_v12 = vadd.f32 %v1431_v11, %v1730_v35 }
 0x292   : > { %v1053_v13 = vpop.f32.mrf.mxu0 }
 0x293   : > { %1134 = vst [vmem:[%s1737_s10 + $0x90] sm:$0xff] %v1062_v12  ;;  %v1054_v14 = vadd.f32 %v1730_v35, %v1053_v13 }
 0x294   : > { %v1432_v15 = vpop.f32.mrf.mxu0 }
 0x295   : > { %1132 = vst [vmem:[%s1737_s10 + $0x80] sm:$0xff] %v1054_v14  ;;  %v1065_v16 = vadd.f32 %v1432_v15, %v1730_v35 }
 0x296   : > { %v1056_v18 = vpop.f32.mrf.mxu0 }
 0x297   : > { %1135 = vst [vmem:[%s1737_s10 + $0x98] sm:$0xff] %v1065_v16  ;;  %v1057_v19 = vadd.f32 %v1730_v35, %v1056_v18 }
 0x298   : > { %v1435_v20 = vpop.f32.mrf.mxu0 }
 0x299   : > { %1133 = vst [vmem:[%s1737_s10 + $0x88] sm:$0xff] %v1057_v19  ;;  %v1078_v21 = vadd.f32 %v1435_v20, %v1730_v35 }
 0x29a   : > { %v1069_v22 = vpop.f32.mrf.mxu0 }
 0x29b   : > { %1138 = vst [vmem:[%s1737_s10 + $0xb0] sm:$0xff] %v1078_v21  ;;  %v1070_v23 = vadd.f32 %v1730_v35, %v1069_v22 }
 0x29c   : > { %v1436_v24 = vpop.f32.mrf.mxu0 }
 0x29d   : > { %1136 = vst [vmem:[%s1737_s10 + $0xa0] sm:$0xff] %v1070_v23  ;;  %v1081_v25 = vadd.f32 %v1436_v24, %v1730_v35 }
 0x29e   : > { %v1072_v27 = vpop.f32.mrf.mxu0 }
 0x29f   : > { %1139 = vst [vmem:[%s1737_s10 + $0xb8] sm:$0xff] %v1081_v25  ;;  %v1073_v28 = vadd.f32 %v1730_v35, %v1072_v27 }
 0x2a0   : > { %v1439_v29 = vpop.f32.mrf.mxu0 }
 0x2a1   : > { %1137 = vst [vmem:[%s1737_s10 + $0xa8] sm:$0xff] %v1073_v28  ;;  %v1094_v8 = vadd.f32 %v1439_v29, %v1730_v35 }
 0x2a2   : > { %v1085_v17 = vpop.f32.mrf.mxu0 }
 0x2a3   : > { %1142 = vst [vmem:[%s1737_s10 + $0xd0] sm:$0xff] %v1094_v8  ;;  %v1086_v30 = vadd.f32 %v1730_v35, %v1085_v17 }
 0x2a4   : > { %v1440_v31 = vpop.f32.mrf.mxu0 }
 0x2a5   : > { %1140 = vst [vmem:[%s1737_s10 + $0xc0] sm:$0xff] %v1086_v30  ;;  %v1097_v32 = vadd.f32 %v1440_v31, %v1730_v35 }
 0x2a6   : > { %v1088_v33 = vpop.f32.mrf.mxu0 }
 0x2a7   : > { %1143 = vst [vmem:[%s1737_s10 + $0xd8] sm:$0xff] %v1097_v32  ;;  %v1089_v34 = vadd.f32 %v1730_v35, %v1088_v33 }
 0x2a8   : > { %v1443_v36 = vpop.f32.mrf.mxu0 }
 0x2a9   : > { %1141 = vst [vmem:[%s1737_s10 + $0xc8] sm:$0xff] %v1089_v34  ;;  %v1110_v37 = vadd.f32 %v1443_v36, %v1730_v35 }
 0x2aa   : > { %v1101_v38 = vpop.f32.mrf.mxu0 }
 0x2ab   : > { %1146 = vst [vmem:[%s1737_s10 + $0xf0] sm:$0xff] %v1110_v37  ;;  %v1102_v39 = vadd.f32 %v1730_v35, %v1101_v38 }
 0x2ac   : > { %v1444_v40 = vpop.f32.mrf.mxu0 }
 0x2ad   : > { %1144 = vst [vmem:[%s1737_s10 + $0xe0] sm:$0xff] %v1102_v39  ;;  %v1113_v26 = vadd.f32 %v1444_v40, %v1730_v35 }
 0x2ae   : > { %v1104_v41 = vpop.f32.mrf.mxu0 }
 0x2af   : > { %1147 = vst [vmem:[%s1737_s10 + $0xf8] sm:$0xff] %v1113_v26  ;;  %v1105_v56 = vadd.f32 %v1730_v35, %v1104_v41 }
 0x2b1   : > { %1145 = vst [vmem:[%s1737_s10 + $0xe8] sm:$0xff] %v1105_v56 }
 0x2b2 PF: > { %s17_s24 = sadd.s32 1, %s1478_s24  }
 0x2b3   : > { %p14_p4 = scmp.ge.s32.totalorder %s17_s24, 4  }
 0x2b5   :  { %16 = sbr.rel (!%p14_p4) target bundleno = 1 (0x1), region = 78 }

</bundles_post_ra>
